<compile_context>
chip_gen: v7x
topology: tpu7x:2x2x1
jax: 0.10.0
libtpu: 0.0.40
codegen_flags: <defaults>
</compile_context>

<pallas_src>
import functools

import jax
import jax.numpy as jnp
from jax import lax
from jax.experimental import pallas as pl
from jax.experimental.pallas import tpu as pltpu

# ----- model config (matches the PyTorch module's forward) -----
B = 2          # batch
N = 8          # sequence length
D = 32         # embed_dim
NUM_HEADS = 4
HEAD_DIM = D // NUM_HEADS  # 8


def _iota_div(shape, dim, divisor):
    """broadcasted_iota(...) // divisor; shift when divisor is a power of two."""
    it = lax.broadcasted_iota(jnp.int32, shape, dim)
    if divisor & (divisor - 1) == 0:
        return it >> (divisor.bit_length() - 1)
    return it // divisor


def _mhsa_kernel(x_ref, wqkv_ref, wot_ref, o_ref, *, seq, d, num_heads, hdim):
    f32 = jnp.float32
    bf16 = jnp.bfloat16

    x = x_ref[...].astype(bf16)           # (seq, d)   one batch row
    wqkv = wqkv_ref[...]                  # (d, 3d)    bf16, [Wq^T | Wk^T | Wv^T]
    wot = wot_ref[...]                    # (d, d)     bf16, Wo^T

    # Fused Q/K/V projection: one MXU push, f32 accumulate.
    qkv = jnp.dot(x, wqkv, preferred_element_type=f32)          # (seq, 3d)
    q = qkv[:, :d]
    k = qkv[:, d:2 * d]
    v = qkv[:, 2 * d:]

    hn = num_heads * seq
    # In-kernel structure masks (no DMA): panel row i belongs to head i//seq,
    # lane l belongs to head l//hdim (both divides are shifts here).
    row_head = _iota_div((hn, d), 0, seq)
    lane_head = _iota_div((hn, d), 1, hdim)
    head_mask = (row_head == lane_head).astype(f32)             # (hn, d)

    # Head-replicated, head-masked K / V panels (sublane concat, no matmul).
    kb = jnp.concatenate([k] * num_heads, axis=0) * head_mask   # (hn, d)
    vb = jnp.concatenate([v] * num_heads, axis=0) * head_mask   # (hn, d)

    # All (head, query, key) scores in one MXU push.  RHS contracted on its
    # last dim -> no K-panel transpose is materialised.
    s = lax.dot_general(q.astype(bf16), kb.astype(bf16),
                        dimension_numbers=(((1,), (1,)), ((), ())),
                        preferred_element_type=f32)
    s = s * (1.0 / float(hdim) ** 0.5)                          # (seq, hn)

    # Segment (per-head) softmax.  With the per-batch grid every column is a
    # real score, so a per-row max is a valid shift and exp() <= 1 always.
    # TODO(synk): for adversarial per-head score gaps > ~87 switch to a true
    # per-segment max to avoid f32 exp underflow in the denominator.
    row_max = jnp.max(s, axis=-1, keepdims=True)
    e = jnp.exp(s - row_max)                                    # (seq, hn) f32
    seg_r = _iota_div((hn, hn), 0, seq)
    seg_c = _iota_div((hn, hn), 1, seq)
    seg = (seg_r == seg_c).astype(f32)                          # (hn, hn)
    denom = jnp.dot(e, seg, preferred_element_type=f32)         # per-head sums
    p = e * pl.reciprocal(denom, approx=True)                   # EUP vrcp

    # PV matmul writes the head-concatenated output directly (no concat/loop).
    attn = jnp.dot(p.astype(bf16), vb.astype(bf16),
                   preferred_element_type=f32)                  # (seq, d)

    # Output projection (weight pre-transposed + pre-cast in the wrapper).
    o_ref[...] = jnp.dot(attn.astype(bf16), wot,
                         preferred_element_type=f32).astype(o_ref.dtype)


def prepare_mhsa_weights(w_q, w_k, w_v, w_o):
    """One-time weight prep, hoisted out of the per-call path: transpose, fuse
    Q/K/V into one (D, 3D) panel, pre-cast to bf16 for the MXU."""
    w_qkv = jnp.concatenate([w_q.T, w_k.T, w_v.T], axis=1).astype(jnp.bfloat16)
    w_o_t = w_o.T.astype(jnp.bfloat16)
    return w_qkv, w_o_t


@functools.partial(jax.jit, static_argnames=("num_heads",))
def multi_head_self_attention(x, w_qkv, w_o_t, *, num_heads=NUM_HEADS):
    """x: (B, N, D) f32; w_qkv: (D, 3D) bf16; w_o_t: (D, D) bf16."""
    b, n, d = x.shape
    hdim = d // num_heads
    x2 = x.reshape(b * n, d)

    kernel = functools.partial(_mhsa_kernel, seq=n, d=d,
                               num_heads=num_heads, hdim=hdim)

    out2 = pl.pallas_call(
        kernel,
        out_shape=jax.ShapeDtypeStruct((b * n, d), x.dtype),
        grid=(b,),
        in_specs=[
            pl.BlockSpec((n, d), lambda i: (i, 0)),       # one batch row of x
            pl.BlockSpec((d, 3 * d), lambda i: (0, 0)),   # weights: constant block
            pl.BlockSpec((d, d), lambda i: (0, 0)),       #   index -> DMA'd once
        ],
        out_specs=pl.BlockSpec((n, d), lambda i: (i, 0)),
        compiler_params=pltpu.CompilerParams(
            dimension_semantics=("parallel",)),           # both TCs on v7x
    )(x2, w_qkv, w_o_t)
    return out2.reshape(b, n, d)


def reference_mhsa(x, w_q, w_k, w_v, w_o):
    """Pure-JAX f32 reference mirroring the PyTorch forward exactly."""
    hp = jax.lax.Precision.HIGHEST
    Bn, Nn, Dn = x.shape
    q = jnp.dot(x, w_q.T, precision=hp)
    k = jnp.dot(x, w_k.T, precision=hp)
    v = jnp.dot(x, w_v.T, precision=hp)
    q = q.reshape(Bn, Nn, NUM_HEADS, HEAD_DIM).transpose(0, 2, 1, 3)
    k = k.reshape(Bn, Nn, NUM_HEADS, HEAD_DIM).transpose(0, 2, 1, 3)
    v = v.reshape(Bn, Nn, NUM_HEADS, HEAD_DIM).transpose(0, 2, 1, 3)
    scores = jnp.einsum("bhqd,bhkd->bhqk", q, k, precision=hp) / (HEAD_DIM ** 0.5)
    weights = jax.nn.softmax(scores, axis=-1)
    attn = jnp.einsum("bhqk,bhkd->bhqd", weights, v, precision=hp)
    attn = attn.transpose(0, 2, 1, 3).reshape(Bn, Nn, Dn)
    return jnp.dot(attn, w_o.T, precision=hp)


if __name__ == "__main__":
    key = jax.random.PRNGKey(0)
    kx, kq, kk, kv, ko = jax.random.split(key, 5)

    x = jax.random.normal(kx, (B, N, D), dtype=jnp.float32)
    # Deterministic weight init (torch Linear layout: (out_features, in_features))
    scale = 1.0 / (D ** 0.5)
    w_q = jax.random.uniform(kq, (D, D), jnp.float32, -scale, scale)
    w_k = jax.random.uniform(kk, (D, D), jnp.float32, -scale, scale)
    w_v = jax.random.uniform(kv, (D, D), jnp.float32, -scale, scale)
    w_o = jax.random.uniform(ko, (D, D), jnp.float32, -scale, scale)

    # One-time weight prep (transpose + fuse + bf16 cast), outside the call path.
    w_qkv, w_o_t = prepare_mhsa_weights(w_q, w_k, w_v, w_o)

    out = multi_head_self_attention(x, w_qkv, w_o_t)
    out = jax.block_until_ready(out)

    ref = reference_mhsa(x, w_q, w_k, w_v, w_o)
    assert out.shape == (B, N, D)
    # bf16 MXU operands (f32 accumulate) -> compare at bf16-appropriate tolerance.
    max_err = jnp.max(jnp.abs(out - ref))
    assert jnp.allclose(out, ref, atol=2e-2, rtol=2e-2), (
        f"mismatch vs reference, max abs err = {max_err}")

    print("KERNEL_OK")
</pallas_src>

<mosaic_0001>
module attributes {stable_mosaic.version = 11 : i64} {
  func.func @_mhsa_kernel(%arg0: i32, %arg1: memref<8x32xf32, #tpu.memory_space<vmem>>, %arg2: memref<32x96xbf16, #tpu.memory_space<vmem>>, %arg3: memref<32x32xbf16, #tpu.memory_space<vmem>>, %arg4: memref<8x32xf32, #tpu.memory_space<vmem>>) attributes {dimension_semantics = [#tpu.dimension_semantics<parallel>], iteration_bounds = array<i64: 2>, scalar_prefetch = 0 : i64, scratch_operands = 0 : i64, tpu.core_type = #tpu.core_type<tc>, window_params = [{transform_indices = @transform_0, window_bounds = array<i64: 8, 32>}, {pipeline_mode = #tpu.pipeline_mode<synchronous>, transform_indices = @transform_1, window_bounds = array<i64: 32, 96>}, {pipeline_mode = #tpu.pipeline_mode<synchronous>, transform_indices = @transform_2, window_bounds = array<i64: 32, 32>}, {transform_indices = @transform_3, window_bounds = array<i64: 8, 32>}]} {
    %c0 = arith.constant 0 : index
    %c0_0 = arith.constant 0 : index
    %0 = vector.load %arg1[%c0, %c0_0] : memref<8x32xf32, #tpu.memory_space<vmem>>, vector<8x32xf32>
    %1 = arith.truncf %0 : vector<8x32xf32> to vector<8x32xbf16>
    %c0_1 = arith.constant 0 : index
    %c0_2 = arith.constant 0 : index
    %2 = vector.load %arg2[%c0_1, %c0_2] : memref<32x96xbf16, #tpu.memory_space<vmem>>, vector<32x96xbf16>
    %c0_3 = arith.constant 0 : index
    %c0_4 = arith.constant 0 : index
    %3 = vector.load %arg3[%c0_3, %c0_4] : memref<32x32xbf16, #tpu.memory_space<vmem>>, vector<32x32xbf16>
    %cst = arith.constant dense<0.000000e+00> : vector<8x96xf32>
    %4 = tpu.matmul %1, %2, %cst {dimension_numbers = #tpu.dot_dimension_numbers<[1], [0], [0], [1], [0, 0, 1, 1], [], []>} : vector<8x32xbf16>, vector<32x96xbf16>, vector<8x96xf32> -> vector<8x96xf32>
    %5 = vector.extract_strided_slice %4 {offsets = [0, 0], sizes = [8, 32], strides = [1, 1]} : vector<8x96xf32> to vector<8x32xf32>
    %6 = vector.extract_strided_slice %4 {offsets = [0, 32], sizes = [8, 32], strides = [1, 1]} : vector<8x96xf32> to vector<8x32xf32>
    %7 = vector.extract_strided_slice %4 {offsets = [0, 64], sizes = [8, 32], strides = [1, 1]} : vector<8x96xf32> to vector<8x32xf32>
    %8 = tpu.iota {dimensions = array<i32: 0>} : vector<32x32xi32>
    %c3_i32 = arith.constant 3 : i32
    %9 = vector.broadcast %c3_i32 : i32 to vector<32x32xi32>
    %10 = arith.shrsi %8, %9 : vector<32x32xi32>
    %11 = tpu.iota {dimensions = array<i32: 1>} : vector<32x32xi32>
    %c3_i32_5 = arith.constant 3 : i32
    %12 = vector.broadcast %c3_i32_5 : i32 to vector<32x32xi32>
    %13 = arith.shrsi %11, %12 : vector<32x32xi32>
    %14 = arith.cmpi eq, %10, %13 : vector<32x32xi32>
    %15 = arith.extui %14 : vector<32x32xi1> to vector<32x32xi32>
    %16 = arith.sitofp %15 : vector<32x32xi32> to vector<32x32xf32>
    %17 = tpu.concatenate %6, %6, %6, %6 in 0 : vector<8x32xf32>, vector<8x32xf32>, vector<8x32xf32>, vector<8x32xf32> -> vector<32x32xf32>
    %18 = arith.mulf %17, %16 : vector<32x32xf32>
    %19 = tpu.concatenate %7, %7, %7, %7 in 0 : vector<8x32xf32>, vector<8x32xf32>, vector<8x32xf32>, vector<8x32xf32> -> vector<32x32xf32>
    %20 = arith.mulf %19, %16 : vector<32x32xf32>
    %21 = arith.truncf %5 : vector<8x32xf32> to vector<8x32xbf16>
    %22 = arith.truncf %18 : vector<32x32xf32> to vector<32x32xbf16>
    %cst_6 = arith.constant dense<0.000000e+00> : vector<8x32xf32>
    %23 = tpu.matmul %21, %22, %cst_6 {dimension_numbers = #tpu.dot_dimension_numbers<[1], [1], [0], [0], [0, 0, 1, 0], [], []>} : vector<8x32xbf16>, vector<32x32xbf16>, vector<8x32xf32> -> vector<8x32xf32>
    %cst_7 = arith.constant 0.353553385 : f32
    %24 = vector.broadcast %cst_7 : f32 to vector<8x32xf32>
    %25 = arith.mulf %23, %24 : vector<8x32xf32>
    %cst_8 = arith.constant dense<0xFF800000> : vector<8xf32>
    %26 = vector.multi_reduction <maximumf>, %25, %cst_8 [1] : vector<8x32xf32> to vector<8xf32>
    %27 = vector.shape_cast %26 : vector<8xf32> to vector<8x1xf32>
    %28 = vector.broadcast %27 : vector<8x1xf32> to vector<8x32xf32>
    %29 = arith.subf %25, %28 : vector<8x32xf32>
    %30 = math.exp %29 : vector<8x32xf32>
    %31 = tpu.iota {dimensions = array<i32: 0>} : vector<32x32xi32>
    %c3_i32_9 = arith.constant 3 : i32
    %32 = vector.broadcast %c3_i32_9 : i32 to vector<32x32xi32>
    %33 = arith.shrsi %31, %32 : vector<32x32xi32>
    %34 = tpu.iota {dimensions = array<i32: 1>} : vector<32x32xi32>
    %c3_i32_10 = arith.constant 3 : i32
    %35 = vector.broadcast %c3_i32_10 : i32 to vector<32x32xi32>
    %36 = arith.shrsi %34, %35 : vector<32x32xi32>
    %37 = arith.cmpi eq, %33, %36 : vector<32x32xi32>
    %38 = arith.extui %37 : vector<32x32xi1> to vector<32x32xi32>
    %39 = arith.sitofp %38 : vector<32x32xi32> to vector<32x32xf32>
    %cst_11 = arith.constant dense<0.000000e+00> : vector<8x32xf32>
    %40 = tpu.matmul %30, %39, %cst_11 {dimension_numbers = #tpu.dot_dimension_numbers<[1], [0], [0], [1], [0, 0, 1, 1], [], []>} : vector<8x32xf32>, vector<32x32xf32>, vector<8x32xf32> -> vector<8x32xf32>
    %41 = tpu.reciprocal %40 {approx = true} : vector<8x32xf32> -> vector<8x32xf32>
    %42 = arith.mulf %30, %41 : vector<8x32xf32>
    %43 = arith.truncf %42 : vector<8x32xf32> to vector<8x32xbf16>
    %44 = arith.truncf %20 : vector<32x32xf32> to vector<32x32xbf16>
    %cst_12 = arith.constant dense<0.000000e+00> : vector<8x32xf32>
    %45 = tpu.matmul %43, %44, %cst_12 {dimension_numbers = #tpu.dot_dimension_numbers<[1], [0], [0], [1], [0, 0, 1, 1], [], []>} : vector<8x32xbf16>, vector<32x32xbf16>, vector<8x32xf32> -> vector<8x32xf32>
    %46 = arith.truncf %45 : vector<8x32xf32> to vector<8x32xbf16>
    %cst_13 = arith.constant dense<0.000000e+00> : vector<8x32xf32>
    %47 = tpu.matmul %46, %3, %cst_13 {dimension_numbers = #tpu.dot_dimension_numbers<[1], [0], [0], [1], [0, 0, 1, 1], [], []>} : vector<8x32xbf16>, vector<32x32xbf16>, vector<8x32xf32> -> vector<8x32xf32>
    %c0_14 = arith.constant 0 : index
    %c0_15 = arith.constant 0 : index
    %48 = vector.load %arg4[%c0_14, %c0_15] : memref<8x32xf32, #tpu.memory_space<vmem>>, vector<8x32xf32>
    tpu.vector_store %arg4[%c0_14, %c0_15], %47 {strides = array<i32>} : memref<8x32xf32, #tpu.memory_space<vmem>>, vector<8x32xf32>,
    return
  }
  func.func @transform_0(%arg0: i32) -> (i32, i32) {
    %c0_i32 = arith.constant 0 : i32
    %c0_i32_0 = arith.constant 0 : i32
    return %arg0, %c0_i32 : i32, i32
  }
  func.func @transform_1(%arg0: i32) -> (i32, i32) {
    %c0_i32 = arith.constant 0 : i32
    %c0_i32_0 = arith.constant 0 : i32
    %c0_i32_1 = arith.constant 0 : i32
    return %c0_i32, %c0_i32_0 : i32, i32
  }
  func.func @transform_2(%arg0: i32) -> (i32, i32) {
    %c0_i32 = arith.constant 0 : i32
    %c0_i32_0 = arith.constant 0 : i32
    %c0_i32_1 = arith.constant 0 : i32
    return %c0_i32, %c0_i32_0 : i32, i32
  }
  func.func @transform_3(%arg0: i32) -> (i32, i32) {
    %c0_i32 = arith.constant 0 : i32
    %c0_i32_0 = arith.constant 0 : i32
    return %arg0, %c0_i32 : i32, i32
  }
}

</mosaic_0001>

<bundles_post_ra>
// kernel: multi_head_self_attention.1
= control target key start
LH: loop header
LB: loop body
LE: loop exit
PB: predicated region body
PF: predicated region fallthrough
CT: control target
= control target key end

     0   :  { %8 = vsyncpa [#allocation3], 0  ;;  %s1391_s0 = inlined_call_operand.hbm [shape: f32[16,32], index: 0, kind: input, shape index: {}]   ;;  %s1392_s1 = inlined_call_operand.hbm [shape: bf16[32,96], index: 1, kind: input, shape index: {}]   ;;  %s1393_s2 = inlined_call_operand.hbm [shape: bf16[32,32], index: 2, kind: input, shape index: {}]   ;;  %s1394_s3 = inlined_call_operand.hbm [shape: f32[16,32], index: 3, kind: output, shape index: {}]  }
   0x1   :  { %10 = vsyncpa [#allocation3 + $0x1], 0 }
   0x2   :  { %11 = vsyncpa [#allocation6], 0 }
   0x3   :  { %12 = vsyncpa [#allocation4], 0 }
   0x4   :  { %14 = vsyncpa [#allocation4 + $0x1], 0  ;;  %s1090_s12 = smov 0   ;;  %s1092_s13 = smov 0  }
   0x5   :  { %s1094_s14 = smov 0   ;;  %s1096_s15 = smov 0  }
   0x6 LB: > { %s1111_s16 = sadd.s32 4294967295, %s1055_s15   ;;  %s696_s17 = sadd.s32 4294967294, %s1055_s15   ;;  %s1055_s15 = sphi %s1096_s15, %s1422_s15   ;;  %s1051_s14 = sphi %s1094_s14, %s1421_s14   ;;  %s1047_s13 = sphi %s1092_s13, %s1420_s13   ;;  %s1043_s12 = sphi %s1090_s12, %s1419_s12  }
   0x7   : > { %p40_p0 = scmp.ne.s32.totalorder %s1047_s13, %s1043_s12  ;;  %p1395_p1 = scmp.eq.s32.totalorder %s1111_s16, 0 }
   0x8   : > { %p112_p3 = scmp.eq.s32.totalorder %s696_s17, 1  ;;  %p697_p5 = scmp.ge.s32.totalorder %s1055_s15, 1 }
   0x9   : > { %p1120_p4 = por %p1395_p1, %p40_p0  ;;  %p119_p7 = scmp.lt.s32.totalorder %s1055_s15, 3 }
   0xa   : > { %p1125_p6 = por %p112_p3, %p40_p0  ;;  %s1057_s21 = smov [#allocation5]  }
   0xb   : > { %s1398_s18 = scalar_select %p1120_p4, 1, 0 }
   0xc   : > { %s1399_s19 = scalar_select %p1125_p6, 1, 0 }
   0xd   : > { %p1130_p8 = pnand %p697_p5, %p119_p7  ;;  %s131_s22 = sshll.u32 %s1057_s21, 4  ;;  %s1134_s22 = int_to_ptr.vmem [resolvable:$true] %s131_s22 }
   0xe   : > { %s1058_s24 = smov [#allocation7]   ;;  %s899_s28 = scalar_lea.hbm %s1392_s1, 256 }
   0xf   : > { %p807_p9 = pneg %p1130_p8  ;;  %s144_s25 = sshll.u32 %s1058_s24, 4  ;;  %s1145_s25 = int_to_ptr.vmem [resolvable:$true] %s144_s25 }
  0x10   : > { %p900_p12 = scmp.ne.s32.totalorder %s1392_s1, %s899_s28  ;;  %p906_p5 = scmp.lt.u32.totalorder %s899_s28, %s1392_s1 }
  0x11   : > { %p1141_p11 = pnand %p807_p9, %p1395_p1 }
  0x13   : > { %p901_p13 = pneg %p1141_p11 }
  0x15   : > { %p902_p0 = pnand %p901_p13, %p900_p12 }
  0x17   : > { %p903_p3 = pneg %p902_p0 }
  0x19   : > { %p908_p7 = pnand %p906_p5, %p903_p3 }
  0x1b   : > { %911 = shalt.err (!%p908_p7)
}
  0x1c   : > { %s912_s6 = scalar_lea.vmem %s1134_s22, 256  ;;  %p920_p2 = scmp.lt.s32.totalorder %s1134_s22, %s1134_s22 }
  0x1d   : > { %p913_p9 = scmp.ne.s32.totalorder %s1134_s22, %s912_s6  ;;  %p921_p12 = scmp.lt.s32.totalorder %s912_s6, %s912_s6 }
  0x1f   : > { %p915_p10 = pnand %p913_p9, %p901_p13  ;;  %p922_p0 = por %p921_p12, %p920_p2 }
  0x21   : > { %p916_p1 = pneg %p915_p10 }
  0x23   : > { %p923_p6 = pnand %p922_p0, %p916_p1 }
  0x25   : > { %926 = shalt.err (!%p923_p6)
}
  0x26   : > { %s1059_s7 = smov 64   ;;  %s1060_s8 = smov 4  }
  0x27   : > { %810 = dma.hbm_to_vmem [thread:$0]  (!%p1141_p11), %s1392_s1, 256, %s1134_s22, [#allocation6], %s1059_s7, %s1059_s7, %s1060_s8  }
  0x28   : > { %s927_s21 = scalar_lea.hbm %s1393_s2, 256 }
  0x29   : > { %p928_p2 = scmp.ne.s32.totalorder %s1393_s2, %s927_s21  ;;  %p934_p10 = scmp.lt.u32.totalorder %s927_s21, %s1393_s2 }
  0x2b   : > { %p930_p1 = pnand %p928_p2, %p901_p13 }
  0x2d   : > { %p931_p6 = pneg %p930_p1 }
  0x2f   : > { %p936_p3 = pnand %p934_p10, %p931_p6 }
  0x31   : > { %939 = shalt.err (!%p936_p3)
}
  0x32   : > { %s940_s22 = scalar_lea.vmem %s1145_s25, 256  ;;  %p948_p12 = scmp.lt.s32.totalorder %s1145_s25, %s1145_s25 }
  0x33   : > { %p941_p5 = scmp.ne.s32.totalorder %s1145_s25, %s940_s22  ;;  %p949_p0 = scmp.lt.s32.totalorder %s940_s22, %s940_s22 }
  0x35   : > { %p943_p7 = pnand %p941_p5, %p901_p13  ;;  %p950_p2 = por %p949_p0, %p948_p12 }
  0x37   : > { %p944_p9 = pneg %p943_p7 }
  0x39   : > { %p951_p1 = pnand %p950_p2, %p944_p9 }
  0x3b   : > { %954 = shalt.err (!%p951_p1)
}
  0x3c   : > { %813 = dma.hbm_to_vmem [thread:$0]  (!%p1141_p11), %s1393_s2, 256, %s1145_s25, [#allocation6], %s1059_s7, %s1059_s7, %s1060_s8  }
  0x3d   : > { %s1200_s4 = sadd.s32 1, %s1055_s15   ;;  %s27_s23 = sadd.s32 1, %s1051_s14 }
  0x3e   : > { %s24_s5 = ssub.s32 %s1055_s15, %s1200_s4  ;;  %p34_p13 = scmp.ne.s32.totalorder %s1051_s14, %s1047_s13 }
  0x3f   : > { %p25_p6 = scmp.eq.s32.totalorder %s24_s5, 0  ;;  %p35_p10 = scmp.eq.s32.totalorder %s1055_s15, 0 }
  0x40   : > { %p1402_p3 = scmp.eq.s32.totalorder %s1111_s16, 1  ;;  %p824_p7 = scmp.lt.s32.totalorder %s1055_s15, 2 }
  0x41   : > { %s1216_s9 = scalar_select %p25_p6, %s1051_s14, %s27_s23  }
  0x42   : > { %p1210_p5 = por %p1402_p3, %p34_p13  ;;  %p36_p9 = por %p35_p10, %p34_p13 }
  0x43   : > { %s158_s10 = sand.u32 1, %s1051_s14   ;;  %s702_s25 = sshll.u32 %s1055_s15, 7 }
  0x44   : > { %s1403_s6 = scalar_select %p1210_p5, 1, 0 }
  0x45   : > { %s701_s11 = sshll.u32 %s158_s10, 3  ;;  %s1223_s17 = scalar_lea.hbm %s1391_s0, %s702_s25 }
  0x46   : > { %s162_s21 = scalar_lea.vmem [#allocation2], %s701_s11  ;;  %p1227_p11 = pnand %p824_p7, %p36_p9 }
  0x47   : > { %s169_s24 = sshll.u32 %s162_s21, 4  ;;  %s159_s27 = scalar_lea.sflag [#allocation3], %s158_s10  ;;  %s1225_s24 = int_to_ptr.vmem [resolvable:$true] %s169_s24 }
  0x48   : > { %s955_s28 = scalar_lea.hbm %s1223_s17, 128  ;;  %p957_p0 = pneg %p1227_p11 }
  0x49   : > { %p956_p12 = scmp.ne.s32.totalorder %s1223_s17, %s955_s28  ;;  %s960_s30 = scalar_lea.hbm %s1391_s0, 256 }
  0x4a   : > { %p961_p13 = scmp.lt.u32.totalorder %s1223_s17, %s1391_s0  ;;  %p962_p6 = scmp.lt.u32.totalorder %s960_s30, %s955_s28 }
  0x4b   : > { %p958_p2 = pnand %p957_p0, %p956_p12  ;;  %p964_p3 = scmp.lt.u32.totalorder %s955_s28, %s1223_s17 }
  0x4c   : > { %p963_p10 = por %p962_p6, %p961_p13 }
  0x4d   : > { %p959_p1 = pneg %p958_p2 }
  0x4e   : > { %p965_p7 = por %p964_p3, %p963_p10 }
  0x50   : > { %p966_p9 = pnand %p965_p7, %p959_p1 }
  0x52   : > { %969 = shalt.err (!%p966_p9)
}
  0x53   : > { %s970_s10 = scalar_lea.vmem %s1225_s24, 128  ;;  %s1061_s11 = smov [#allocation2]  }
  0x54   : > { %p971_p12 = scmp.ne.s32.totalorder %s1225_s24, %s970_s10  ;;  %s975_s25 = sshll.u32 %s1061_s11, 4  ;;  %s976_s25 = int_to_ptr.vmem [resolvable:$false] %s975_s25 }
  0x55   : > { %s977_s7 = scalar_lea.vmem %s976_s25, 256  ;;  %p978_p4 = scmp.lt.s32.totalorder %s1225_s24, %s976_s25 }
  0x56   : > { %p973_p2 = pnand %p971_p12, %p957_p0  ;;  %p979_p13 = scmp.lt.s32.totalorder %s977_s7, %s970_s10 }
  0x58   : > { %p974_p5 = pneg %p973_p2  ;;  %p980_p6 = por %p979_p13, %p978_p4 }
  0x5a   : > { %p981_p10 = pnand %p980_p6, %p974_p5 }
  0x5c   : > { %984 = shalt.err (!%p981_p10)
}
  0x5d   : > { %817 = dma.hbm_to_vmem [thread:$0]  (!%p1227_p11), %s1223_s17, 128, %s1225_s24, %s159_s27  }
  0x5e   : > { %178 = sbr.rel (%p1130_p8) target bundleno = 1502 (0x5de), region = 32  ;;  %s1259_s8 = sand.u32 (!%p1130_p8), 1, %s1047_s13  }
  0x5f   : > { %s704_s21 = sshll.u32 (!%p1130_p8), %s1259_s8, 3  ;;  %s181_s28 = scalar_lea.sflag (!%p1130_p8), [#allocation3], %s1259_s8 }
  0x60   : > { %s184_s22 = scalar_lea.vmem (!%p1130_p8), [#allocation2], %s704_s21  ;;  %p1405_p4 = scmp.ne.s32.totalorder (!%p1130_p8), %s1398_s18, 0 }
  0x65   : > { %1030 = dma.done.wait (%p1405_p4), %s181_s28, 128  }
  0x66   : > { %1032 = vsyncadd (%p1405_p4), %s181_s28, 4294967168  ;;  %p1406_p5 = scmp.eq.s32.totalorder %s1111_s16, 0 }
  0x68   : > { %1034 = dma.done.wait (%p1406_p5), [#allocation6], 512   ;;  %p1407_p8 = pmov %p1406_p5 }
  0x69   : > { %v282_v0 = vlaneseq  ;;  %v1062_v1 = vmov 0.0   ;;  %vm1063_vm0 = vmmov 0   ;;  %v891_v12 = vld [vmem:[#allocation5] sm:$0xff]   ;;  %v892_v14 = vld [vmem:[#allocation5 + $0x8] sm:$0xff]   ;;  %v216_v18 = vld [vmem:[%s184_s22] sm:$0xff]  ;;  %s1064_s18 = smov 32  }
  0x6a   : > { %1036 = vsyncadd (%p1407_p8), [#allocation6], 4294966784  ;;  %746 = vmatprep.subr.bf16.mxu0 %v1062_v1  ;;  %750 = vmatprep.mubr.msk.bf16.mxu0 %vm1063_vm0, %v1062_v1  ;;  %v217_v24 = vpack.c.bf16 %v216_v18, %v216_v18  ;;  %vm238_vm6 = vcmask 261120   ;;  %s1065_s20 = smov 96   ;;  %s1066_s17 = smov 64   ;;  %v893_v10 = vld [vmem:[#allocation7] sm:$0xff]  }
  0x6b   : > { %v283_v2 = vshrl.u32 %v282_v0, 7  ;;  %v292_v3 = vand.u32 127, %v282_v0  ;;  %754 = vmatprep.subr.bf16.mxu1 %v1062_v1  ;;  %758 = vmatprep.mubr.msk.bf16.mxu1 %vm1063_vm0, %v1062_v1  ;;  %s726_s24 = sshll.u32 %s1111_s16, 7  ;;  %s214_s26 = scalar_lea.vmem [#allocation8], %s704_s21 }
  0x6c   : > { %747 = vmatpush3.bf16.msra.mxu0 %v891_v12  ;;  %s607_s27 = sshll.u32 %s214_s26, 4  ;;  %s1346_s23 = scalar_lea.hbm %s1394_s3, %s726_s24  ;;  %s1348_s27 = int_to_ptr.vmem [resolvable:$true] %s607_s27 }
  0x6d   : > { %v284_v4 = vadd.s32 8, %v283_v2  ;;  %v287_v5 = vshra.s32 %v283_v2, 3  ;;  %v293_v6 = vshra.s32 %v292_v3, 3  ;;  %v285_v7 = vadd.s32 16, %v283_v2  ;;  %748 = vmatprep.subr.bf16.mxu0 %v1062_v1  ;;  %s594_s5 = scalar_lea.sflag [#allocation4], %s1259_s8  ;;  %s985_s16 = scalar_lea.vmem %s1348_s27, 128 }
  0x6e   : > { %v286_v8 = vadd.s32 24, %v283_v2  ;;  %v1067_v2 = vmov 0.0|0.0   ;;  %v1068_v3 = vmov 1.0|1.0   ;;  %p986_p11 = scmp.ne.s32.totalorder %s1348_s27, %s985_s16  ;;  %p1416_p0 = scmp.ne.s32.totalorder %s1403_s6, 0 }
  0x6f   : > { %v288_v9 = vshra.s32 %v284_v4, 3  ;;  %vm1279_vm1 = vcmp.eq.s32.totalorder %v287_v5, %v293_v6  ;;  %v289_v11 = vshra.s32 %v285_v7, 3  ;;  %s1069_s10 = smov [#allocation8]  }
  0x70   : > { %v711_v13 = vsel %vm1279_vm1, 1.0, %v1062_v1  ;;  %v290_v16 = vshra.s32 %v286_v8, 3  ;;  %749 = vmatpush3.bf16.msra.mxu0 %v892_v14  ;;  %p987_p1 = pnand %p986_p11, %p1416_p0  ;;  %s989_s11 = sshll.u32 %s1069_s10, 4  ;;  %s990_s11 = int_to_ptr.vmem [resolvable:$false] %s989_s11 }
  0x71   : > { %vm1286_vm2 = vcmp.eq.s32.totalorder %v288_v9, %v293_v6  ;;  %vm1290_vm3 = vcmp.eq.s32.totalorder %v289_v11, %v293_v6  ;;  %789 = vmatprep.subr.bf16.mxu0 %v1067_v2  ;;  %v894_v11 = vld [vmem:[#allocation7 + $0x8] sm:$0xff]   ;;  %s991_s25 = scalar_lea.vmem %s990_s11, 256  ;;  %p992_p7 = scmp.lt.s32.totalorder %s1348_s27, %s990_s11 }
  0x72   : > { %v712_v19 = vsel %vm1286_vm2, 1.0, %v1062_v1  ;;  %vm790_vm4 = vmpackc.low %vm1286_vm2, %vm1279_vm1  ;;  %v713_v20 = vsel %vm1290_vm3, 1.0, %v1062_v1  ;;  %vm1305_vm5 = vcmp.eq.s32.totalorder %v290_v16, %v293_v6  ;;  %p988_p3 = pneg %p987_p1  ;;  %p993_p9 = scmp.lt.s32.totalorder %s991_s25, %s985_s16 }
  0x73   : > { %v881_v21 = vpack.i.bf16 %v712_v19, %v711_v13  ;;  %v714_v23 = vsel %vm1305_vm5, 1.0, %v1062_v1  ;;  %751 = vmatmul.mubr.msk.bf16.vlgmr.msra.gmra.mrb[0].mxu0 %vm238_vm6, %v217_v24  ;;  %vm793_vm7 = vmpackc.low %vm1305_vm5, %vm1290_vm3 }
  0x74   : > { %v876_v25 = vpack.i.bf16 %v714_v23, %v713_v20  ;;  %770 = vmatprep.mubr.msk.f32.mxu0 %vm1063_vm0, %v1062_v1  ;;  %791 = vmatpush3.bf16.msk.msra.mxu0 %vm790_vm4, %v1068_v3  ;;  %p994_p12 = por %p993_p9, %p992_p7 }
  0x75   : > { %872 = vrot.lane.b32.xlu0 %v881_v21, %s1064_s18  ;;  %792 = vmatprep.subr.bf16.mxu0 %v1067_v2 }
  0x76   : > { %p995_p2 = pnand %p994_p12, %p988_p3 }
  0x78   : > { %794 = vmatpush3.bf16.msk.msra.mxu0 %vm793_vm7, %v1068_v3 }
  0x79   : > { %877 = vrot.lane.b32.xlu0 %v876_v25, %s1064_s18  ;;  %773 = vmatprep.subr.bf16.mxu0 %v1062_v1 }
  0xe7   : > { %v873_v26 = vpop.permute.xlu0 %872 }
  0xe8   : > { %v875_v28 = vunpack.i.h.bf16 %v873_v26  ;;  %v874_v29 = vunpack.i.l.bf16 %v873_v26 }
  0xeb   : > { %v878_v27 = vpop.permute.xlu0 %877 }
  0xec   : > { %v880_v30 = vunpack.i.h.bf16 %v878_v27  ;;  %v879_v31 = vunpack.i.l.bf16 %v878_v27 }
 0x146   : > { %v276_v32 = vpop.f32.mrb[0].mxu0 }
 0x147   : > { %v752_v33 = vpop.f32.mrb[1].mxu0  ;;  %v322_v34 = vmul.f32 %v874_v29, %v276_v32  ;;  %v323_v35 = vmul.f32 %v875_v28, %v276_v32  ;;  %v324_v39 = vmul.f32 %v879_v31, %v276_v32  ;;  %v325_v40 = vmul.f32 %v880_v30, %v276_v32 }
 0x148   : > { %v279_v36 = vpop.f32.mrb[2].mxu0  ;;  %v342_v57 = vpack.c.bf16 %v276_v32, %v276_v32 }
 0x149   : > { %v753_v37 = vpop.f32.mrb[3].mxu0  ;;  %v343_v38 = vpack.c.bf16 %v323_v35, %v322_v34  ;;  %v344_v41 = vpack.c.bf16 %v325_v40, %v324_v39 }
 0x14b   : > { %347 = vrot.lane.b32.xlu1 %v343_v38, %s1065_s20 }
 0x14f   : > { %349 = vrot.lane.b32.xlu1 %v344_v41, %s1065_s20 }
 0x153   : > { %882 = vrot.lane.b32.xlu1 %v881_v21, %s1066_s17 }
 0x157   : > { %887 = vrot.lane.b32.xlu1 %v876_v25, %s1066_s17 }
 0x1bd   : > { %v348_v42 = vpop.permute.xlu1 %347 }
 0x1be   : > { %v355_v43 = vsel %vm238_vm6, %v348_v42, 0 }
 0x1bf   : > { %755 = vmatpush3.bf16.xpose.msra.mxu1 %v355_v43 }
 0x1c0   : > { %756 = vmatprep.subr.bf16.mxu1 %v1062_v1 }
 0x1c1   : > { %v350_v44 = vpop.permute.xlu1 %349 }
 0x1c2   : > { %v358_v46 = vsel %vm238_vm6, %v350_v44, 0 }
 0x1c5   : > { %v883_v45 = vpop.permute.xlu1 %882 }
 0x1c6   : > { %v885_v47 = vunpack.i.h.bf16 %v883_v45  ;;  %v884_v48 = vunpack.i.l.bf16 %v883_v45 }
 0x1c7   : > { %757 = vmatpush3.bf16.xpose.msra.mxu1 %v358_v46 }
 0x1c8   : > { %v339_v49 = vmul.f32 %v885_v47, %v276_v32  ;;  %v338_v50 = vmul.f32 %v884_v48, %v276_v32  ;;  %781 = vmatprep.subr.bf16.mxu1 %v1062_v1 }
 0x1c9   : > { %v888_v51 = vpop.permute.xlu1 %887 }
 0x1ca   : > { %v890_v52 = vunpack.i.h.bf16 %v888_v51  ;;  %v889_v53 = vunpack.i.l.bf16 %v888_v51  ;;  %v483_v54 = vpack.c.bf16 %v339_v49, %v338_v50 }
 0x1cc   : > { %v341_v55 = vmul.f32 %v890_v52, %v276_v32  ;;  %v340_v56 = vmul.f32 %v889_v53, %v276_v32  ;;  %487 = vrot.lane.b32.xlu1 %v483_v54, %s1066_s17 }
 0x1ce   : > { %759 = vmatmul.mubr.msk.bf16.vlgmr.msra.gmra.mrb[0].mxu1 %vm238_vm6, %v342_v57  ;;  %v484_v58 = vpack.c.bf16 %v341_v55, %v340_v56 }
 0x1cf   : > { %785 = vmatprep.mubr.msk.bf16.mxu1 %vm1063_vm0, %v1062_v1  ;;  %782 = vmatpush3.bf16.msra.mxu1 %v893_v10 }
 0x1d0   : > { %489 = vrot.lane.b32.xlu1 %v484_v58, %s1066_s17  ;;  %783 = vmatprep.subr.bf16.mxu1 %v1062_v1 }
 0x1d3   : > { %784 = vmatpush3.bf16.msra.mxu1 %v894_v11 }
 0x23e   : > { %v488_v7 = vpop.permute.xlu1 %487 }
 0x242   : > { %v490_v9 = vpop.permute.xlu1 %489 }
 0x2a1   : > { %v394_v59 = vpop.f32.mrb[0].mxu1 }
 0x2a2   : > { %v400_v60 = vmul.f32 0.35355338, %v394_v59  ;;  %v760_v61 = vpop.f32.mrb[1].mxu1 }
 0x2a3   : > { %v397_v62 = vpop.f32.mrb[2].mxu1 }
 0x2a4   : > { %v761_v63 = vpop.f32.mrb[3].mxu1  ;;  %v401_v0 = vsel %vm238_vm6, %v400_v60, -inf }
 0x2a5   : > { %402 = vmax.xlane.f32.xlu0 %v401_v0 }
 0x332   : > { %v403_v4 = vpop.xlane.xlu0 %402 }
 0x333   : > { %v404_v5 = vsub.f32 %v400_v60, %v403_v4 }
 0x335   : > { %v405_v6 = vmul.f32 1.442695, %v404_v5 }
 0x337   : > { %895 = vpow2.f32 %v405_v6 }
 0x341   : > { %v896_v8 = vpop.eup %895 }
 0x342   : > { %771 = vmatmul.mubr.msk.f32.vlgmr.msra.gmra.mrb[4].mxu0 %vm238_vm6, %v896_v8 }
 0x343   : > { %774 = vmatpush3.bf16.msra.mxu0 %v488_v7  ;;  %777 = vmatprep.mubr.msk.bf16.mxu0 %vm1063_vm0, %v1062_v1 }
 0x344   : > { %775 = vmatprep.subr.bf16.mxu0 %v1062_v1 }
 0x347   : > { %776 = vmatpush3.bf16.msra.mxu0 %v490_v9 }
 0x415   : > { %v476_v12 = vpop.f32.mrb[4].mxu0 }
 0x416   : > { %897 = vrcp.f32 %v476_v12  ;;  %v772_v13 = vpop.f32.mrb[5].mxu0 }
 0x420   : > { %v898_v14 = vpop.eup %897 }
 0x421   : > { %v481_v15 = vmul.f32 %v898_v14, %v896_v8 }
 0x423   : > { %v482_v16 = vpack.c.bf16 %v481_v15, %v481_v15 }
 0x425   : > { %778 = vmatmul.mubr.msk.bf16.vlgmr.msra.gmra.mrb[8].mxu0 %vm238_vm6, %v482_v16 }
 0x4f8   : > { %v530_v17 = vpop.f32.mrb[8].mxu0 }
 0x4f9   : > { %v536_v18 = vpack.c.bf16 %v530_v17, %v530_v17  ;;  %v779_v19 = vpop.f32.mrb[9].mxu0 }
 0x4fa   : > { %v533_v20 = vpop.f32.mrb[10].mxu0 }
 0x4fb   : > { %v780_v21 = vpop.f32.mrb[11].mxu0  ;;  %786 = vmatmul.mubr.msk.bf16.vlgmr.msra.gmra.mrb[4].mxu1 %vm238_vm6, %v536_v18 }
 0x5ce   : > { %v586_v1 = vpop.f32.mrb[4].mxu1 }
 0x5cf   : > { %592 = vst.msk [vmem:[%s214_s26] sm:$0xff] %vm238_vm6, %v586_v1  ;;  %v787_v22 = vpop.f32.mrb[5].mxu1 }
 0x5d0   : > { %v589_v23 = vpop.f32.mrb[6].mxu1 }
 0x5d1   : > { %998 = shalt.err (!%p995_p2)
}
 0x5d2   : > { %s999_s7 = scalar_lea.hbm %s1346_s23, 128  ;;  %s1003_s28 = scalar_lea.hbm %s1394_s3, 256 }
 0x5d3   : > { %p1000_p13 = scmp.ne.s32.totalorder %s1346_s23, %s999_s7  ;;  %p1004_p4 = scmp.lt.u32.totalorder %s1346_s23, %s1394_s3 }
 0x5d4   : > { %p1005_p5 = scmp.lt.u32.totalorder %s1003_s28, %s999_s7  ;;  %p1007_p11 = scmp.lt.u32.totalorder %s999_s7, %s1346_s23 }
 0x5d5   : > { %p1001_p6 = pnand %p1000_p13, %p1416_p0 }
 0x5d6   : > { %p1006_p8 = por %p1005_p5, %p1004_p4 }
 0x5d7   : > { %p1002_p10 = pneg %p1001_p6 }
 0x5d8   : > { %p1008_p1 = por %p1007_p11, %p1006_p8 }
 0x5da   : > { %p1009_p3 = pnand %p1008_p1, %p1002_p10 }
 0x5dc   : > { %1012 = shalt.err (!%p1009_p3)
}
 0x5dd   : > { %805 = dma.vmem_to_hbm [thread:$0]  (%p1416_p0), %s1348_s27, 128, %s1346_s23, %s594_s5   ;;  %v788_v24 = vpop.f32.mrb[7].mxu1 }
 0x5de PF: > { %s619_s20 = sand.u32 1, %s1043_s12   ;;  %p1417_p7 = scmp.ne.s32.totalorder %s1399_s19, 0 }
 0x5df   : > { %p1418_p9 = scmp.ge.s32.totalorder %s1055_s15, 2  ;;  %s620_s17 = scalar_lea.sflag [#allocation4], %s619_s20 }
 0x5e1   : > { %p819_p12 = pnand %p1418_p9, %p1417_p7 }
 0x5e3   : > { %1038 = dma.done.wait (!%p819_p12), %s620_s17, 128  }
 0x5e4   : > { %1040 = vsyncadd (!%p819_p12), %s620_s17, 4294967168  ;;  %p17_p2 = scmp.ge.s32.totalorder %s1200_s4, 4   ;;  %s1419_s12 = smov %s1047_s13 }
 0x5e5   : > { %s1420_s13 = smov %s1051_s14  ;;  %s1421_s14 = smov %s1216_s9 }
 0x5e6   : > { %s1422_s15 = smov %s1200_s4  ;;  %19 = sbr.rel (!%p17_p2) target bundleno = 6 (0x6), region = 85 }
 0x5ed   :  { %625 = vsyncpa [#allocation3], 1 }
 0x5ee   :  { %627 = vsyncpa [#allocation3 + $0x1], 1 }
 0x5ef   :  { %628 = vsyncpa [#allocation6], 1 }
 0x5f0   :  { %629 = vsyncpa [#allocation4], 1 }
 0x5f1   :  { %631 = vsyncpa [#allocation4 + $0x1], 1 }

</bundles_post_ra>
